<compile_context>
chip_gen: v5e
topology: v5e:2x2
jax: 0.10.0
libtpu: 0.0.40
codegen_flags: <defaults>
</compile_context>

<pallas_src>
import numpy as np

import jax
import jax.numpy as jnp
from jax.experimental import pallas as pl
from jax.experimental.pallas import tpu as pltpu


_VMEM_LIMIT_BYTES = 32 * 1024 * 1024   # explicit scoped-VMEM limit (< v7x 64 MiB physical)


def _vmem_budget_bytes():
    # Budget for the buffers we model (blocks + resident replication tile).
    # Roofline saturates around 512-1024-row blocks, so ~10-16 MiB is plenty;
    # keep it small enough to be safe on v5e and leave Mosaic scratch headroom.
    try:
        cap = pltpu.get_tpu_info().vmem_capacity_bytes
        return int(min(16 << 20, max(8 << 20, cap // 8)))
    except Exception:
        return 10 << 20


# ----------------------------------------------------------------------------
# Kernels
# ----------------------------------------------------------------------------

def _up2_fused_kernel(x_ref, r_ref, o_ref):
    """Small-W path: one 0/1-selection matmul emits the full lane-dense slab."""
    xv = x_ref[...].astype(r_ref.dtype)
    o_ref[...] = jnp.dot(
        xv, r_ref[...], preferred_element_type=r_ref.dtype
    ).astype(o_ref.dtype)


def _up2_tiled_kernel(x_ref, r_ref, o_ref, dup_ref):
    """Large-W path.  grid = (row_blocks, ncb, 2); h = output half (innermost).

    The x block index is independent of h, so Pallas keeps the same VMEM input
    buffer across the two h steps (no second HBM read).  The duplicated slab is
    computed once per input block (h == 0) into VMEM scratch and stored for
    both output halves.
    """
    @pl.when(pl.program_id(2) == 0)
    def _():
        xv = x_ref[...].astype(r_ref.dtype)
        dup_ref[...] = jnp.dot(
            xv, r_ref[...], preferred_element_type=r_ref.dtype
        ).astype(dup_ref.dtype)

    o_ref[...] = dup_ref[...]


# ----------------------------------------------------------------------------
# Replication matrices (numpy -> baked jit constants)
# ----------------------------------------------------------------------------

def _rep_matrix_tiled(wb, dtype):
    # R[p, m] = 1 iff p == m // 2   ->   out[:, 2t] = out[:, 2t+1] = x[:, t]
    p = np.arange(wb)[:, None]
    m = np.arange(2 * wb)[None, :]
    return jnp.asarray(p == (m // 2), dtype=dtype)


def _rep_matrix_fused(k, w, dtype):
    # k input rows fused into one lane-dense super-row.  Output super-row is
    # [dup(x_j) | dup(x_j)] for each fused row j, concatenated, so a plain
    # row-major reshape recovers (N, C, 2H, 2W).
    p = np.arange(k * w)[:, None]
    m = np.arange(4 * k * w)[None, :]
    sel = (p // w == m // (4 * w)) & ((p % w) == (m % (2 * w)) // 2)
    return jnp.asarray(sel, dtype=dtype)


# ----------------------------------------------------------------------------
# Tiling helper
# ----------------------------------------------------------------------------

def _pick_row_block(rows, per_row_bytes, resident_bytes, budget_bytes, min_steps=8):
    """Largest 8-aligned divisor of `rows` that fits the VMEM budget and still
    leaves >= min_steps row-axis grid steps (pipelining + megacore)."""
    cap = max(8, (budget_bytes - resident_bytes) // max(per_row_bytes, 1))
    cap = min(cap, max(8, (rows // min_steps) // 8 * 8))
    if rows <= 8 or rows % 8 != 0:
        return rows                      # tiny / ragged row count: single block
    m = rows // 8
    best = 8
    d = 1
    while d * d <= m:
        if m % d == 0:
            for f in (d, m // d):
                rb = 8 * f
                if best < rb <= cap:
                    best = rb
        d += 1
    return best


# ----------------------------------------------------------------------------
# Wrapper
# ----------------------------------------------------------------------------

@jax.jit
def upsample_nearest_2x(x):
    """Nearest-neighbor 2x upsample of an NCHW tensor via a Pallas TPU kernel."""
    N, C, H, W = x.shape
    io_dtype = x.dtype

    # Compute dtype: bf16 stays bf16 (bf16 MXU path); everything else runs
    # through f32 *inside the kernel* (cast after load / before store) so no
    # wrapper-level HBM cast passes are added for int / f16 inputs.
    # TODO(synk): integer inputs are exact only for |v| < 2^24 (f32 compute).
    cdtype = jnp.bfloat16 if io_dtype == jnp.bfloat16 else jnp.float32

    rows = N * C * H
    in_esz = jnp.dtype(io_dtype).itemsize
    c_esz = jnp.dtype(cdtype).itemsize
    budget = _vmem_budget_bytes()

    x2d = x.reshape(rows, W)                         # free row-major reshape

    if W > 128 and W % 128 == 0:
        # ---- large-W path: 128-wide input lane tiles -> 256-wide output tiles.
        wb = 128
        ncb = W // wb
        rmat = _rep_matrix_tiled(wb, cdtype)
        # per-row VMEM: in block (x2) + out block (x2) + dup scratch
        per_row = 2 * wb * in_esz + 2 * (2 * wb) * in_esz + (2 * wb) * in_esz
        resident = 2 * wb * (2 * wb) * c_esz
        rb = _pick_row_block(rows, per_row, resident, budget)

        out2d = pl.pallas_call(
            _up2_tiled_kernel,
            out_shape=jax.ShapeDtypeStruct((rows, 4 * W), io_dtype),
            grid=(rows // rb, ncb, 2),
            in_specs=[
                # Same input block for both h steps -> no duplicate DMA.
                pl.BlockSpec((rb, wb), lambda i, j, h: (i, j)),
                # Constant index_map -> replication tile stays VMEM-resident.
                pl.BlockSpec((wb, 2 * wb), lambda i, j, h: (0, 0)),
            ],
            out_specs=pl.BlockSpec((rb, 2 * wb), lambda i, j, h: (i, h * ncb + j)),
            scratch_shapes=[pltpu.VMEM((rb, 2 * wb), io_dtype)],
            compiler_params=pltpu.CompilerParams(
                dimension_semantics=("parallel", "arbitrary", "arbitrary"),
                vmem_limit_bytes=_VMEM_LIMIT_BYTES,
            ),
        )(x2d, rmat)
    else:
        # ---- small / ragged-W path: fuse k consecutive rows into the lane axis
        # so output blocks are lane-dense (~512 lanes, unmasked stores).
        # TODO(synk): ragged W > 128 falls back to k = 1 (rmat is W x 4W); fine
        # for moderate W but not tiled for very large non-128-multiple W.
        k_max = max(1, 512 // (4 * W))
        k = 1
        for kk in range(min(k_max, rows), 0, -1):
            if rows % kk == 0:
                k = kk
                break
        rows_f = rows // k
        kw = k * W
        okw = 4 * kw
        rmat = _rep_matrix_fused(k, W, cdtype)
        per_row = 2 * kw * in_esz + 2 * okw * in_esz
        resident = 2 * kw * okw * c_esz
        rb = _pick_row_block(rows_f, per_row, resident, budget)

        out2d = pl.pallas_call(
            _up2_fused_kernel,
            out_shape=jax.ShapeDtypeStruct((rows_f, okw), io_dtype),
            grid=(rows_f // rb,),
            in_specs=[
                pl.BlockSpec((rb, kw), lambda i: (i, 0)),
                pl.BlockSpec((kw, okw), lambda i: (0, 0)),
            ],
            out_specs=pl.BlockSpec((rb, okw), lambda i: (i, 0)),
            compiler_params=pltpu.CompilerParams(
                dimension_semantics=("parallel",),
                vmem_limit_bytes=_VMEM_LIMIT_BYTES,
            ),
        )(x2d.reshape(rows_f, kw), rmat)

    # Row-major reshape to (N, C, 2H, 2W) is free:
    # flat index ((n*C+c)*H + h)*4W + r*2W + 2w + s
    #          == (((n*C+c)*2H + 2h + r)*2W + 2w + s).
    return out2d.reshape(N, C, 2 * H, 2 * W)


if __name__ == "__main__":
    key = jax.random.PRNGKey(0)

    # Small NCHW input consistent with the module's forward (proGAN stage).
    x = jax.random.normal(key, (2, 4, 16, 16), dtype=jnp.float32)
    out = jax.block_until_ready(upsample_nearest_2x(x))
    ref = jnp.repeat(jnp.repeat(x, 2, axis=-2), 2, axis=-1)
    assert out.shape == (2, 4, 32, 32), out.shape
    assert out.dtype == x.dtype, out.dtype
    assert jnp.allclose(out, ref, atol=1e-6, rtol=1e-6), "small-W path mismatch"

    # Also exercise the large-W (lane-tiled, shared-input-block) path.
    x2 = jax.random.normal(jax.random.PRNGKey(1), (1, 2, 8, 256), dtype=jnp.float32)
    out2 = jax.block_until_ready(upsample_nearest_2x(x2))
    ref2 = jnp.repeat(jnp.repeat(x2, 2, axis=-2), 2, axis=-1)
    assert out2.shape == (1, 2, 16, 512), out2.shape
    assert out2.dtype == x2.dtype, out2.dtype
    assert jnp.allclose(out2, ref2, atol=1e-6, rtol=1e-6), "large-W path mismatch"

    print("KERNEL_OK")
</pallas_src>

<mosaic_0001>
module attributes {stable_mosaic.version = 11 : i64} {
  func.func @_up2_fused_kernel(%arg0: i32, %arg1: memref<8x128xf32, #tpu.memory_space<vmem>>, %arg2: memref<128x512xf32, #tpu.memory_space<vmem>>, %arg3: memref<8x512xf32, #tpu.memory_space<vmem>>) attributes {dimension_semantics = [#tpu.dimension_semantics<parallel>], iteration_bounds = array<i64: 2>, scalar_prefetch = 0 : i64, scratch_operands = 0 : i64, tpu.core_type = #tpu.core_type<tc>, window_params = [{transform_indices = @transform_0, window_bounds = array<i64: 8, 128>}, {pipeline_mode = #tpu.pipeline_mode<synchronous>, transform_indices = @transform_1, window_bounds = array<i64: 128, 512>}, {transform_indices = @transform_2, window_bounds = array<i64: 8, 512>}]} {
    %c0 = arith.constant 0 : index
    %c0_0 = arith.constant 0 : index
    %0 = vector.load %arg1[%c0, %c0_0] : memref<8x128xf32, #tpu.memory_space<vmem>>, vector<8x128xf32>
    %c0_1 = arith.constant 0 : index
    %c0_2 = arith.constant 0 : index
    %1 = vector.load %arg2[%c0_1, %c0_2] : memref<128x512xf32, #tpu.memory_space<vmem>>, vector<128x512xf32>
    %cst = arith.constant dense<0.000000e+00> : vector<8x512xf32>
    %2 = tpu.matmul %0, %1, %cst {dimension_numbers = #tpu.dot_dimension_numbers<[1], [0], [0], [1], [0, 0, 1, 1], [], []>} : vector<8x128xf32>, vector<128x512xf32>, vector<8x512xf32> -> vector<8x512xf32>
    %c0_3 = arith.constant 0 : index
    %c0_4 = arith.constant 0 : index
    %3 = vector.load %arg3[%c0_3, %c0_4] : memref<8x512xf32, #tpu.memory_space<vmem>>, vector<8x512xf32>
    tpu.vector_store %arg3[%c0_3, %c0_4], %2 {strides = array<i32>} : memref<8x512xf32, #tpu.memory_space<vmem>>, vector<8x512xf32>,
    return
  }
  func.func @transform_0(%arg0: i32) -> (i32, i32) {
    %c0_i32 = arith.constant 0 : i32
    %c0_i32_0 = arith.constant 0 : i32
    return %arg0, %c0_i32 : i32, i32
  }
  func.func @transform_1(%arg0: i32) -> (i32, i32) {
    %c0_i32 = arith.constant 0 : i32
    %c0_i32_0 = arith.constant 0 : i32
    %c0_i32_1 = arith.constant 0 : i32
    return %c0_i32, %c0_i32_0 : i32, i32
  }
  func.func @transform_2(%arg0: i32) -> (i32, i32) {
    %c0_i32 = arith.constant 0 : i32
    %c0_i32_0 = arith.constant 0 : i32
    return %arg0, %c0_i32 : i32, i32
  }
}

</mosaic_0001>

<bundles_post_ra>
// kernel: upsample_nearest_2x.1
= control target key start
LH: loop header
LB: loop body
LE: loop exit
PB: predicated region body
PF: predicated region fallthrough
CT: control target
= control target key end

     0   :  { %7 = vsyncpa [#allocation3], 0  ;;  %s468_s9 = smov 0   ;;  %s499_s0 = inlined_call_operand.vmem [shape: f32[16,128], index: 0, kind: input, shape index: {}]   ;;  %s500_s1 = inlined_call_operand.hbm [shape: f32[128,512], index: 1, kind: input, shape index: {}]   ;;  %s501_s2 = inlined_call_operand.vmem [shape: f32[16,512], index: 2, kind: output, shape index: {}]  }
   0x1 LB: > { %s102_s12 = sshll.u32 %s500_s1, 4  ;;  %s477_s13 = sadd.s32 4294967295, %s448_s9   ;;  %s448_s9 = sphi %s468_s9, %s13_s9   ;;  %s103_s12 = int_to_ptr.hbm [resolvable:$true] %s102_s12 }
   0x2   : > { %p376_p0 = scmp.ge.s32.totalorder %s448_s9, 1  ;;  %p91_p1 = scmp.lt.s32.totalorder %s448_s9, 3 }
   0x3   : > { %p395_p2 = scmp.eq.s32.totalorder %s477_s13, 0  ;;  %s450_s14 = smov [#allocation2]  }
   0x4   : > { %p92_p3 = pnand %p376_p0, %p91_p1  ;;  %s104_s15 = sshll.u32 %s450_s14, 4  ;;  %s105_s15 = int_to_ptr.vmem [resolvable:$true] %s104_s15 }
   0x5   : > { %s451_s16 = smov 512   ;;  %s452_s17 = smov 32  }
   0x6   : > { %p391_p4 = pneg %p92_p3  ;;  %127 = sbr.rel (%p92_p3) target bundleno = 178 (0xb2), region = 28 }
   0x8   : > { %p392_p5 = pnand %p395_p2, %p391_p4 }
   0xa   : > { %394 = dma.hbm_to_vmem [thread:$0]  (!%p392_p5), %s103_s12, 8192, %s105_s15, [#allocation3], %s451_s16, %s451_s16, %s452_s17  }
   0xb   : > { %443 = dma.done.wait (%p395_p2), [#allocation3], 8192  }
   0xc   : > { %445 = vsyncadd (%p395_p2), [#allocation3], 4294959104  ;;  %v221_v0 = vld [vmem:[#allocation2 + $0x1f0] sm:$0xff]  ;;  %v222_v1 = vld [vmem:[#allocation2 + $0x1f8] sm:$0xff]  ;;  %p149_p6 = scmp.lt.s32.totalorder %s477_s13, 1 }
   0xd   : > { %v217_v2 = vld [vmem:[#allocation2 + $0x1d0] sm:$0xff]  ;;  %263 = vmatpush.msra.mxu2 %v221_v0  ;;  %283 = vmatpush.msra.mxu3 %v222_v1  ;;  %v218_v3 = vld [vmem:[#allocation2 + $0x1d8] sm:$0xff]  ;;  %v219_v6 = vld [vmem:[#allocation2 + $0x1e0] sm:$0xff] }
   0xe   : > { %v213_v4 = vld [vmem:[#allocation2 + $0x1b0] sm:$0xff]  ;;  %v214_v5 = vld [vmem:[#allocation2 + $0x1b8] sm:$0xff]  ;;  %v220_v7 = vld [vmem:[#allocation2 + $0x1e8] sm:$0xff]  ;;  %223 = vmatpush.msra.mxu0 %v219_v6  ;;  %s503_s13 = smov (!%p149_p6, %s477_s13), 1 }
   0xf   : > { %264 = vmatpush.msra.mxu2 %v217_v2  ;;  %284 = vmatpush.msra.mxu3 %v218_v3  ;;  %v215_v8 = vld [vmem:[#allocation2 + $0x1c0] sm:$0xff]  ;;  %v216_v9 = vld [vmem:[#allocation2 + $0x1c8] sm:$0xff]  ;;  %v209_v10 = vld [vmem:[#allocation2 + $0x190] sm:$0xff]  ;;  %s381_s18 = sshll.u32 %s503_s13, 3  ;;  %s386_s22 = sshll.u32 %s503_s13, 5 }
  0x10   : > { %243 = vmatpush.msra.mxu1 %v220_v7  ;;  %v210_v11 = vld [vmem:[#allocation2 + $0x198] sm:$0xff]  ;;  %v211_v12 = vld [vmem:[#allocation2 + $0x1a0] sm:$0xff]  ;;  %v212_v13 = vld [vmem:[#allocation2 + $0x1a8] sm:$0xff]  ;;  %224 = vmatpush.msra.mxu0 %v215_v8  ;;  %s152_s21 = scalar_lea.vmem %s499_s0, %s381_s18  ;;  %s157_s25 = scalar_lea.vmem %s501_s2, %s386_s22 }
  0x11   : > { %265 = vmatpush.msra.mxu2 %v213_v4  ;;  %285 = vmatpush.msra.mxu3 %v214_v5  ;;  %v205_v14 = vld [vmem:[#allocation2 + $0x170] sm:$0xff]  ;;  %v206_v15 = vld [vmem:[#allocation2 + $0x178] sm:$0xff]  ;;  %v207_v16 = vld [vmem:[#allocation2 + $0x180] sm:$0xff] }
  0x12   : > { %244 = vmatpush.msra.mxu1 %v216_v9  ;;  %v208_v17 = vld [vmem:[#allocation2 + $0x188] sm:$0xff]  ;;  %225 = vmatpush.msra.mxu0 %v211_v12  ;;  %v201_v18 = vld [vmem:[#allocation2 + $0x150] sm:$0xff]  ;;  %v202_v19 = vld [vmem:[#allocation2 + $0x158] sm:$0xff] }
  0x13   : > { %266 = vmatpush.msra.mxu2 %v209_v10  ;;  %286 = vmatpush.msra.mxu3 %v210_v11  ;;  %v203_v20 = vld [vmem:[#allocation2 + $0x160] sm:$0xff]  ;;  %v204_v21 = vld [vmem:[#allocation2 + $0x168] sm:$0xff]  ;;  %v197_v22 = vld [vmem:[#allocation2 + $0x130] sm:$0xff] }
  0x14   : > { %245 = vmatpush.msra.mxu1 %v212_v13  ;;  %226 = vmatpush.msra.mxu0 %v207_v16  ;;  %v198_v23 = vld [vmem:[#allocation2 + $0x138] sm:$0xff]  ;;  %v199_v24 = vld [vmem:[#allocation2 + $0x140] sm:$0xff]  ;;  %v200_v25 = vld [vmem:[#allocation2 + $0x148] sm:$0xff] }
  0x15   : > { %267 = vmatpush.msra.mxu2 %v205_v14  ;;  %287 = vmatpush.msra.mxu3 %v206_v15  ;;  %v193_v26 = vld [vmem:[#allocation2 + $0x110] sm:$0xff]  ;;  %v194_v27 = vld [vmem:[#allocation2 + $0x118] sm:$0xff]  ;;  %v195_v28 = vld [vmem:[#allocation2 + $0x120] sm:$0xff] }
  0x16   : > { %246 = vmatpush.msra.mxu1 %v208_v17  ;;  %227 = vmatpush.msra.mxu0 %v203_v20  ;;  %v196_v29 = vld [vmem:[#allocation2 + $0x128] sm:$0xff]  ;;  %v189_v30 = vld [vmem:[#allocation2 + $0xf0] sm:$0xff]  ;;  %v190_v31 = vld [vmem:[#allocation2 + $0xf8] sm:$0xff] }
  0x17   : > { %268 = vmatpush.msra.mxu2 %v201_v18  ;;  %288 = vmatpush.msra.mxu3 %v202_v19  ;;  %v191_v32 = vld [vmem:[#allocation2 + $0x100] sm:$0xff]  ;;  %v192_v33 = vld [vmem:[#allocation2 + $0x108] sm:$0xff]  ;;  %v185_v34 = vld [vmem:[#allocation2 + $0xd0] sm:$0xff] }
  0x18   : > { %247 = vmatpush.msra.mxu1 %v204_v21  ;;  %228 = vmatpush.msra.mxu0 %v199_v24  ;;  %v186_v35 = vld [vmem:[#allocation2 + $0xd8] sm:$0xff]  ;;  %v187_v36 = vld [vmem:[#allocation2 + $0xe0] sm:$0xff]  ;;  %v188_v37 = vld [vmem:[#allocation2 + $0xe8] sm:$0xff] }
  0x19   : > { %269 = vmatpush.msra.mxu2 %v197_v22  ;;  %289 = vmatpush.msra.mxu3 %v198_v23  ;;  %v181_v38 = vld [vmem:[#allocation2 + $0xb0] sm:$0xff]  ;;  %v182_v39 = vld [vmem:[#allocation2 + $0xb8] sm:$0xff]  ;;  %v183_v40 = vld [vmem:[#allocation2 + $0xc0] sm:$0xff] }
  0x1a   : > { %248 = vmatpush.msra.mxu1 %v200_v25  ;;  %229 = vmatpush.msra.mxu0 %v195_v28  ;;  %v184_v41 = vld [vmem:[#allocation2 + $0xc8] sm:$0xff]  ;;  %v177_v42 = vld [vmem:[#allocation2 + $0x90] sm:$0xff]  ;;  %v178_v43 = vld [vmem:[#allocation2 + $0x98] sm:$0xff] }
  0x1b   : > { %270 = vmatpush.msra.mxu2 %v193_v26  ;;  %290 = vmatpush.msra.mxu3 %v194_v27  ;;  %v179_v44 = vld [vmem:[#allocation2 + $0xa0] sm:$0xff]  ;;  %v180_v45 = vld [vmem:[#allocation2 + $0xa8] sm:$0xff]  ;;  %v173_v46 = vld [vmem:[#allocation2 + $0x70] sm:$0xff] }
  0x1c   : > { %249 = vmatpush.msra.mxu1 %v196_v29  ;;  %230 = vmatpush.msra.mxu0 %v191_v32  ;;  %v174_v47 = vld [vmem:[#allocation2 + $0x78] sm:$0xff]  ;;  %v175_v48 = vld [vmem:[#allocation2 + $0x80] sm:$0xff]  ;;  %v176_v49 = vld [vmem:[#allocation2 + $0x88] sm:$0xff] }
  0x1d   : > { %271 = vmatpush.msra.mxu2 %v189_v30  ;;  %291 = vmatpush.msra.mxu3 %v190_v31  ;;  %v169_v50 = vld [vmem:[#allocation2 + $0x50] sm:$0xff]  ;;  %v170_v51 = vld [vmem:[#allocation2 + $0x58] sm:$0xff]  ;;  %v171_v52 = vld [vmem:[#allocation2 + $0x60] sm:$0xff] }
  0x1e   : > { %250 = vmatpush.msra.mxu1 %v192_v33  ;;  %231 = vmatpush.msra.mxu0 %v187_v36  ;;  %v172_v53 = vld [vmem:[#allocation2 + $0x68] sm:$0xff]  ;;  %v165_v54 = vld [vmem:[#allocation2 + $0x30] sm:$0xff]  ;;  %v166_v55 = vld [vmem:[#allocation2 + $0x38] sm:$0xff] }
  0x1f   : > { %272 = vmatpush.msra.mxu2 %v185_v34  ;;  %292 = vmatpush.msra.mxu3 %v186_v35  ;;  %v167_v56 = vld [vmem:[#allocation2 + $0x40] sm:$0xff]  ;;  %v168_v57 = vld [vmem:[#allocation2 + $0x48] sm:$0xff]  ;;  %v161_v58 = vld [vmem:[#allocation2 + $0x10] sm:$0xff] }
  0x20   : > { %251 = vmatpush.msra.mxu1 %v188_v37  ;;  %232 = vmatpush.msra.mxu0 %v183_v40  ;;  %v162_v59 = vld [vmem:[#allocation2 + $0x18] sm:$0xff]  ;;  %v158_v60 = vld [vmem:[%s152_s21] sm:$0xff]  ;;  %v164_v62 = vld [vmem:[#allocation2 + $0x28] sm:$0xff] }
  0x21   : > { %273 = vmatpush.msra.mxu2 %v181_v38  ;;  %293 = vmatpush.msra.mxu3 %v182_v39  ;;  %v163_v61 = vld [vmem:[#allocation2 + $0x20] sm:$0xff]  ;;  %v160_v0 = vld [vmem:[#allocation2 + $0x8] sm:$0xff] }
  0x22   : > { %252 = vmatpush.msra.mxu1 %v184_v41  ;;  %233 = vmatpush.msra.mxu0 %v179_v44  ;;  %v159_v63 = vld [vmem:[#allocation2] sm:$0xff] }
  0x23   : > { %274 = vmatpush.msra.mxu2 %v177_v42  ;;  %294 = vmatpush.msra.mxu3 %v178_v43 }
  0x24   : > { %253 = vmatpush.msra.mxu1 %v180_v45  ;;  %234 = vmatpush.msra.mxu0 %v175_v48 }
  0x25   : > { %275 = vmatpush.msra.mxu2 %v173_v46  ;;  %295 = vmatpush.msra.mxu3 %v174_v47 }
  0x26   : > { %254 = vmatpush.msra.mxu1 %v176_v49  ;;  %235 = vmatpush.msra.mxu0 %v171_v52 }
  0x27   : > { %276 = vmatpush.msra.mxu2 %v169_v50  ;;  %296 = vmatpush.msra.mxu3 %v170_v51 }
  0x28   : > { %255 = vmatpush.msra.mxu1 %v172_v53  ;;  %236 = vmatpush.msra.mxu0 %v167_v56 }
  0x29   : > { %277 = vmatpush.msra.mxu2 %v165_v54  ;;  %297 = vmatpush.msra.mxu3 %v166_v55 }
  0x2a   : > { %256 = vmatpush.msra.mxu1 %v168_v57  ;;  %237 = vmatpush.msra.mxu0 %v163_v61 }
  0x2b   : > { %278 = vmatpush.msra.mxu2 %v161_v58  ;;  %298 = vmatpush.msra.mxu3 %v162_v59 }
  0x2c   : > { %279 = vmatmul.f32.vlgmr.msra.gmra.mxu2 %v158_v60  ;;  %299 = vmatmul.f32.vlgmr.msra.gmra.mxu3 %v158_v60 }
  0x2d   : > { %257 = vmatpush.msra.mxu1 %v164_v62  ;;  %238 = vmatpush.msra.mxu0 %v159_v63 }
  0x2e   : > { %239 = vmatmul.f32.vlgmr.msra.gmra.mxu0 %v158_v60 }
  0x2f   : > { %258 = vmatpush.msra.mxu1 %v160_v0 }
  0x30   : > { %259 = vmatmul.f32.vlgmr.msra.gmra.mxu1 %v158_v60 }
  0xab   : > { %v240_v1 = vpop.f32.mrf.mxu0 }
  0xac   : > { %303 = vst [vmem:[%s157_s25] sm:$0xff] %v240_v1 }
  0xad   : > { %v260_v2 = vpop.f32.mrf.mxu1 }
  0xae   : > { %304 = vst [vmem:[%s157_s25 + $0x8] sm:$0xff] %v260_v2 }
  0xaf   : > { %v280_v3 = vpop.f32.mrf.mxu2  ;;  %v300_v4 = vpop.f32.mrf.mxu3 }
  0xb0   : > { %305 = vst [vmem:[%s157_s25 + $0x10] sm:$0xff] %v280_v3 }
  0xb1   : > { %306 = vst [vmem:[%s157_s25 + $0x18] sm:$0xff] %v300_v4 }
  0xb2 PF: > { %s13_s9 = sadd.s32 1, %s448_s9  }
  0xb3   : > { %p10_p7 = scmp.ge.s32.totalorder %s13_s9, 4  }
  0xb5   :  { %12 = sbr.rel (!%p10_p7) target bundleno = 1 (0x1), region = 63 }
  0xba   :  { %328 = vsyncpa [#allocation3], 1 }
  0xbb   :  { %330 = vsyncpa [#allocation3 + $0x1], 1 }

</bundles_post_ra>
